<compile_context>
chip_gen: v5e
topology: v5e:2x2
jax: 0.10.0
libtpu: 0.0.40
codegen_flags: <defaults>
</compile_context>

<pallas_src>
import jax
import jax.numpy as jnp
from jax.experimental import pallas as pl
from jax.experimental.pallas import tpu as pltpu


OUT_COLS = 3   # [lower, upper, coeff]


def _round_up(x, m):
    return ((x + m - 1) // m) * m


# --------------------------------------------------------------------------
# Kernels
# --------------------------------------------------------------------------
def _piven_kernel_single(x_ref, w_ref, bm_ref, o_ref):
    # x_ref:  [TB, H]      activations (compute dtype, straight into the MXU)
    # w_ref:  [H, OUTW]    fused + zero-padded weights (grid-invariant block)
    # bm_ref: [2, OUTW]    row 0 = fused bias (f32), row 1 = sigmoid-column mask
    # o_ref:  [TB, OUTW]
    y = jnp.dot(x_ref[...], w_ref[...], preferred_element_type=jnp.float32)
    y = y + bm_ref[0:1, :]
    o_ref[...] = jnp.where(bm_ref[1:2, :] != 0.0, jax.nn.sigmoid(y), y).astype(o_ref.dtype)


def _piven_kernel_ktiled(x_ref, w_ref, bm_ref, o_ref, acc_ref):
    # Same as above but with a K-reduction grid axis and an f32 accumulator.
    k = pl.program_id(1)
    part = jnp.dot(x_ref[...], w_ref[...], preferred_element_type=jnp.float32)

    @pl.when(k == 0)
    def _():
        acc_ref[...] = bm_ref[0:1, :] + part   # fold bias into the init

    @pl.when(k > 0)
    def _():
        acc_ref[...] += part

    @pl.when(k == pl.num_programs(1) - 1)
    def _():
        y = acc_ref[...]
        o_ref[...] = jnp.where(bm_ref[1:2, :] != 0.0, jax.nn.sigmoid(y), y).astype(o_ref.dtype)


# --------------------------------------------------------------------------
# Parameter preparation (call once per set of weights; hoisted out of forward)
# --------------------------------------------------------------------------
def piven_prepare(w1, b1, w2, b2, *, compute_dtype=jnp.bfloat16):
    """Fuse the two Linear layers into one zero-padded weight + bias/mask block.

    w1: [2, H], b1: [2], w2: [1, H], b2: [1]  (PyTorch nn.Linear layout).
    Returns (w_pad [H, OUTW] in compute_dtype, bm [2, OUTW] f32).
    """
    H = w1.shape[1]
    outw = 8 if H <= 256 else 128          # lane padding of the tiny 3-wide output

    w_fused = jnp.concatenate([w1.T, w2.T], axis=1)                 # [H, 3]
    w_pad = (jnp.zeros((H, outw), compute_dtype)
             .at[:, :OUT_COLS].set(w_fused.astype(compute_dtype)))

    bias = jnp.concatenate([b1, b2], axis=0).astype(jnp.float32)    # [3]
    bm = jnp.zeros((2, outw), jnp.float32)
    bm = bm.at[0, :OUT_COLS].set(bias)     # row 0: bias
    bm = bm.at[1, 2].set(1.0)              # row 1: sigmoid mask (coeff column only)
    return w_pad, bm


# --------------------------------------------------------------------------
# Forward
# --------------------------------------------------------------------------
def piven_forward(x, w_pad, bm, *, out_dtype=None):
    """x: [B, H]; w_pad/bm from piven_prepare().  Returns [B, 3]."""
    B, H = x.shape
    Hw, OUTW = w_pad.shape
    assert Hw == H, (Hw, H)
    out_dtype = out_dtype or x.dtype
    compute_dtype = w_pad.dtype
    x = x.astype(compute_dtype)            # bf16 by default: halves the dominant HBM stream
    x_isz = jnp.dtype(compute_dtype).itemsize
    out_isz = jnp.dtype(out_dtype).itemsize

    # --- K tiling: prefer TK == H (weight resident, single K step). ---------
    if H * OUTW * x_isz <= 8 * 1024 * 1024:
        TK = H
    else:
        TK = 0
        for cand in range(8192, 0, -128):  # largest 128-multiple divisor <= 8192
            if H % cand == 0:
                TK = cand
                break
        if TK == 0:
            TK = H                         # no clean divisor: fall back to full rows
    assert H % TK == 0, "K tile must divide H exactly"
    n_k = H // TK

    # --- batch tiling: ~6 MiB per x buffer, multiple of 8; >=2 batch steps ---
    tb_budget = max(8, (6 * 1024 * 1024) // max(1, TK * x_isz))
    TB = max(8, min(2048, (tb_budget // 8) * 8))
    if B >= 16:
        TB = min(TB, _round_up(pl.cdiv(B, 2), 8))   # keep grid[0] >= 2 (v7x megacore)
    TB = max(8, min(TB, _round_up(B, 8)))
    n_b = pl.cdiv(B, TB)                   # partial final block is masked; no jnp.pad copy

    # --- explicit VMEM budget (double-buffered x/w/out + acc) + headroom ----
    vmem_bytes = (2 * TB * TK * x_isz           # x double buffer
                  + 2 * TK * OUTW * x_isz       # weights
                  + 2 * TB * OUTW * out_isz     # output
                  + 2 * 8 * 128 * 4             # bias/mask tile padding
                  + (TB * OUTW * 4 if n_k > 1 else 0))
    vmem_limit = min(100 * 2**20, max(32 * 2**20, int(vmem_bytes * 1.5)))

    cost = pl.CostEstimate(
        flops=2 * B * H * OUTW,
        transcendentals=B * OUTW,
        bytes_accessed=B * H * x_isz + B * OUTW * out_isz + H * OUTW * x_isz,
    )

    if n_k == 1:
        grid_spec = pltpu.PrefetchScalarGridSpec(
            num_scalar_prefetch=0,
            grid=(n_b,),
            in_specs=[
                pl.BlockSpec((TB, H), lambda i: (i, 0)),       # x row tiles
                pl.BlockSpec((H, OUTW), lambda i: (0, 0)),     # weights, fetched once
                pl.BlockSpec((2, OUTW), lambda i: (0, 0)),     # bias + mask, fetched once
            ],
            out_specs=pl.BlockSpec((TB, OUTW), lambda i: (i, 0)),
        )
        kernel = _piven_kernel_single
        dims = ("parallel",)
    else:
        grid_spec = pltpu.PrefetchScalarGridSpec(
            num_scalar_prefetch=0,
            grid=(n_b, n_k),
            in_specs=[
                pl.BlockSpec((TB, TK), lambda i, k: (i, k)),
                pl.BlockSpec((TK, OUTW), lambda i, k: (k, 0)),
                pl.BlockSpec((2, OUTW), lambda i, k: (0, 0)),
            ],
            out_specs=pl.BlockSpec((TB, OUTW), lambda i, k: (i, 0)),
            scratch_shapes=[pltpu.VMEM((TB, OUTW), jnp.float32)],
        )
        kernel = _piven_kernel_ktiled
        dims = ("parallel", "arbitrary")

    out = pl.pallas_call(
        kernel,
        out_shape=jax.ShapeDtypeStruct((B, OUTW), out_dtype),
        grid_spec=grid_spec,
        compiler_params=pltpu.CompilerParams(
            dimension_semantics=dims, vmem_limit_bytes=vmem_limit),
        cost_estimate=cost,
    )(x, w_pad, bm)

    return out[:, :OUT_COLS]


def piven_reference(x, w1, b1, w2, b2):
    interval = x @ w1.T + b1
    coeff = jax.nn.sigmoid(x @ w2.T + b2)
    return jnp.concatenate([interval, coeff], axis=1)


if __name__ == "__main__":
    key = jax.random.PRNGKey(0)
    B, H = 8, 32

    kx, kw1, kb1, kw2, kb2 = jax.random.split(key, 5)
    x = jax.random.normal(kx, (B, H), dtype=jnp.float32)

    # Deterministic init mimicking nn.Linear (uniform +/- 1/sqrt(fan_in)).
    bound = 1.0 / jnp.sqrt(jnp.float32(H))
    w1 = jax.random.uniform(kw1, (2, H), minval=-bound, maxval=bound, dtype=jnp.float32)
    b1 = jax.random.uniform(kb1, (2,), minval=-bound, maxval=bound, dtype=jnp.float32)
    w2 = jax.random.uniform(kw2, (1, H), minval=-bound, maxval=bound, dtype=jnp.float32)
    b2 = jax.random.uniform(kb2, (1,), minval=-bound, maxval=bound, dtype=jnp.float32)

    ref = piven_reference(x, w1, b1, w2, b2)

    # 1) f32 compute path: exact check against the reference.
    w_pad32, bm32 = piven_prepare(w1, b1, w2, b2, compute_dtype=jnp.float32)
    out32 = jax.block_until_ready(piven_forward(x, w_pad32, bm32))
    assert out32.shape == (B, 3), out32.shape
    assert jnp.allclose(out32, ref, atol=1e-5, rtol=1e-5), jnp.max(jnp.abs(out32 - ref))

    # 2) Default bf16 MXU path: loose tolerance (bf16 input/weight rounding).
    w_pad, bm = piven_prepare(w1, b1, w2, b2)
    out = jax.block_until_ready(piven_forward(x, w_pad, bm))
    assert out.shape == (B, 3), out.shape
    assert jnp.allclose(out, ref, atol=3e-2, rtol=3e-2), jnp.max(jnp.abs(out - ref))

    print("KERNEL_OK")
</pallas_src>

<mosaic_0001>
module attributes {stable_mosaic.version = 11 : i64} {
  func.func @_piven_kernel_single(%arg0: i32, %arg1: memref<8x32xf32, #tpu.memory_space<vmem>>, %arg2: memref<32x8xf32, #tpu.memory_space<vmem>>, %arg3: memref<2x8xf32, #tpu.memory_space<vmem>>, %arg4: memref<8x8xf32, #tpu.memory_space<vmem>>) attributes {dimension_semantics = [#tpu.dimension_semantics<parallel>], iteration_bounds = array<i64: 1>, scalar_prefetch = 0 : i64, scratch_operands = 0 : i64, tpu.core_type = #tpu.core_type<tc>, window_params = [{transform_indices = @transform_0, window_bounds = array<i64: 8, 32>}, {pipeline_mode = #tpu.pipeline_mode<synchronous>, transform_indices = @transform_1, window_bounds = array<i64: 32, 8>}, {pipeline_mode = #tpu.pipeline_mode<synchronous>, transform_indices = @transform_2, window_bounds = array<i64: 2, 8>}, {transform_indices = @transform_3, window_bounds = array<i64: 8, 8>}]} {
    %c0 = arith.constant 0 : index
    %c0_0 = arith.constant 0 : index
    %0 = vector.load %arg1[%c0, %c0_0] : memref<8x32xf32, #tpu.memory_space<vmem>>, vector<8x32xf32>
    %c0_1 = arith.constant 0 : index
    %c0_2 = arith.constant 0 : index
    %1 = vector.load %arg2[%c0_1, %c0_2] : memref<32x8xf32, #tpu.memory_space<vmem>>, vector<32x8xf32>
    %cst = arith.constant dense<0.000000e+00> : vector<8x8xf32>
    %2 = tpu.matmul %0, %1, %cst {dimension_numbers = #tpu.dot_dimension_numbers<[1], [0], [0], [1], [0, 0, 1, 1], [], []>} : vector<8x32xf32>, vector<32x8xf32>, vector<8x8xf32> -> vector<8x8xf32>
    %c0_3 = arith.constant 0 : index
    %c0_4 = arith.constant 0 : index
    %3 = vector.load %arg3[%c0_3, %c0_4] : memref<2x8xf32, #tpu.memory_space<vmem>>, vector<1x8xf32>
    %4 = vector.broadcast %3 : vector<1x8xf32> to vector<8x8xf32>
    %5 = arith.addf %2, %4 : vector<8x8xf32>
    %c1 = arith.constant 1 : index
    %c0_5 = arith.constant 0 : index
    %6 = vector.load %arg3[%c1, %c0_5] : memref<2x8xf32, #tpu.memory_space<vmem>>, vector<1x8xf32>
    %cst_6 = arith.constant 0.000000e+00 : f32
    %7 = vector.broadcast %cst_6 : f32 to vector<1x8xf32>
    %8 = arith.cmpf one, %6, %7 : vector<1x8xf32>
    %9 = arith.negf %5 : vector<8x8xf32>
    %10 = math.exp %9 : vector<8x8xf32>
    %cst_7 = arith.constant 1.000000e+00 : f32
    %11 = vector.broadcast %cst_7 : f32 to vector<8x8xf32>
    %12 = arith.addf %11, %10 : vector<8x8xf32>
    %13 = arith.divf %11, %12 : vector<8x8xf32>
    %14 = vector.shape_cast %8 : vector<1x8xi1> to vector<1x8xi1>
    %15 = vector.broadcast %14 : vector<1x8xi1> to vector<8x8xi1>
    %16 = arith.select %15, %13, %5 : vector<8x8xi1>, vector<8x8xf32>
    %c0_8 = arith.constant 0 : index
    %c0_9 = arith.constant 0 : index
    %17 = vector.load %arg4[%c0_8, %c0_9] : memref<8x8xf32, #tpu.memory_space<vmem>>, vector<8x8xf32>
    tpu.vector_store %arg4[%c0_8, %c0_9], %16 {strides = array<i32>} : memref<8x8xf32, #tpu.memory_space<vmem>>, vector<8x8xf32>,
    return
  }
  func.func @transform_0(%arg0: i32) -> (i32, i32) {
    %c0_i32 = arith.constant 0 : i32
    %c0_i32_0 = arith.constant 0 : i32
    return %arg0, %c0_i32 : i32, i32
  }
  func.func @transform_1(%arg0: i32) -> (i32, i32) {
    %c0_i32 = arith.constant 0 : i32
    %c0_i32_0 = arith.constant 0 : i32
    %c0_i32_1 = arith.constant 0 : i32
    return %c0_i32, %c0_i32_0 : i32, i32
  }
  func.func @transform_2(%arg0: i32) -> (i32, i32) {
    %c0_i32 = arith.constant 0 : i32
    %c0_i32_0 = arith.constant 0 : i32
    %c0_i32_1 = arith.constant 0 : i32
    return %c0_i32, %c0_i32_0 : i32, i32
  }
  func.func @transform_3(%arg0: i32) -> (i32, i32) {
    %c0_i32 = arith.constant 0 : i32
    %c0_i32_0 = arith.constant 0 : i32
    return %arg0, %c0_i32 : i32, i32
  }
}

</mosaic_0001>

<bundles_post_ra>
// kernel: tpu_custom_call.1
= control target key start
LH: loop header
LB: loop body
LE: loop exit
PB: predicated region body
PF: predicated region fallthrough
CT: control target
= control target key end

     0   :  { %s170_s0 = inlined_call_operand.vmem [shape: f32[8,32], index: 0, kind: input, shape index: {}]   ;;  %s171_s1 = inlined_call_operand.vmem [shape: f32[32,8], index: 1, kind: input, shape index: {}]   ;;  %s172_s2 = inlined_call_operand.vmem [shape: f32[2,8], index: 2, kind: input, shape index: {}]   ;;  %s173_s3 = inlined_call_operand.hbm [shape: f32[8,8], index: 3, kind: output, shape index: {}]  }
   0x1   :  { %v19_v0 = vld [vmem:[%s171_s1 + $0x18] sm:$0xff]  ;;  %v18_v1 = vld [vmem:[%s171_s1 + $0x10] sm:$0xff]  ;;  %v17_v2 = vld [vmem:[%s171_s1 + $0x8] sm:$0xff] }
   0x2   :  { %38 = vmatpush.msra.mxu0 %v19_v0 }
   0x3   :  { %8 = vsyncpa [#allocation3], 0  ;;  %v16_v3 = vld [vmem:[%s171_s1] sm:$0xff]  ;;  %vm22_vm0 = vcmask 261120   ;;  %v124_v14 = vmov 0   ;;  %s80_s28 = sshll.u32 %s173_s3, 4  ;;  %s81_s28 = int_to_ptr.hbm [resolvable:$true] %s80_s28 }
   0x4   :  { %39 = vmatpush.msra.mxu0 %v18_v1  ;;  %v15_v4 = vld [vmem:[%s170_s0] sm:$0xff]  ;;  %s125_s0 = smov [#allocation2]   ;;  %vm71_vm7 = vcmask 64512  }
   0x5   :  { %v93_v5 = vld [vmem:[%s172_s2] ss:$0 sm:$0xff]  ;;  %v46_v11 = vld [vmem:[%s172_s2 + $0x1] sm:$0x1]  ;;  %s78_s25 = sshll.u32 %s125_s0, 4  ;;  %s79_s25 = int_to_ptr.vmem [resolvable:$true] %s78_s25 }
   0x6   :  { %40 = vmatpush.msra.mxu0 %v17_v2  ;;  %vm47_vm1 = vcmp.ne.f32.partialorder %v46_v11, 0.0 }
   0x7   :  { %v67_v15 = vsel %vm47_vm1, 1, %v124_v14 }
   0x8   :  { %41 = vmatpush.msra.mxu0 %v16_v3  ;;  %v68_v18 = vperm.slane %v67_v15, 0 }
   0x9   :  { %89 = vmatmul.msk.f32.vlgmr.msra.gmra.mxu0 %vm22_vm0, %v15_v4 }
   0xa   :  { %vm69_vm5 = vcmp.eq.s32.totalorder %v68_v18, 1 }
  0x86   :  { %v43_v6 = vpop.f32.mrf.mxu0 }
  0x87   :  { %v44_v7 = vadd.f32 %v93_v5, %v43_v6 }
  0x89   :  { %v90_v8 = vmul.f32 -1.442695, %v44_v7 }
  0x8b   :  { %94 = vpow2.f32 %v90_v8 }
  0x91   :  { %v95_v9 = vpop.eup %94 }
  0x92   :  { %v51_v10 = vadd.f32 1.0, %v95_v9 }
  0x94   :  { %96 = vrcp.f32 %v51_v10  ;;  %v63_v17 = vand.u32 2147483648, %v51_v10  ;;  %v61_v20 = vand.u32 2147483647, %v51_v10  ;;  %vm57_vm3 = vweird.f32 %v51_v10 }
  0x96   :  { %v64_v22 = vor.u32 1.1754944e-38, %v63_v17  ;;  %vm62_vm6 = vcmp.eq.f32.partialorder %v61_v20, 8.507059e+37 }
  0x9a   :  { %v97_v12 = vpop.eup %96 }
  0x9b   :  { %v53_v13 = vmul.f32 %v97_v12, %v51_v10  ;;  %vm58_vm2 = vweird.f32 %v97_v12 }
  0x9c   :  { %vm59_vm4 = vmor %vm57_vm3, %vm58_vm2 }
  0x9d   :  { %v54_v16 = vsub.f32 1.0, %v53_v13 }
  0x9f   :  { %v55_v19 = vmul.f32 %v97_v12, %v54_v16 }
  0xa1   :  { %v56_v21 = vadd.f32 %v97_v12, %v55_v19 }
  0xa3   :  { %v60_v23 = vsel %vm59_vm4, %v97_v12, %v56_v21 }
  0xa4   :  { %v65_v24 = vsel %vm62_vm6, %v64_v22, %v60_v23 }
  0xa5   :  { %v70_v25 = vsel %vm69_vm5, %v65_v24, %v44_v7 }
  0xa6   :  { %72 = vst.msk [vmem:[#allocation2] sm:$0xff] %vm71_vm7, %v70_v25 }
  0xa7   :  { %83 = dma.vmem_to_hbm [thread:$0]  %s79_s25, 128, %s81_s28, [#allocation3]  }
  0xa8   :  { %122 = dma.done.wait [#allocation3], 128  }
  0xa9   :  { %123 = vsyncadd [#allocation3], 4294967168 }
  0xaa   :  { %88 = vsyncpa [#allocation3], 1 }

</bundles_post_ra>
